<compile_context>
chip_gen: v6e
topology: v6e:2x2x1
jax: 0.10.0
libtpu: 0.0.40
codegen_flags: <defaults>
</compile_context>

<pallas_src>
import math

import jax
import jax.numpy as jnp
from jax.experimental import pallas as pl
from jax.experimental.pallas import tpu as pltpu

IN_FEATURES = 32
OUT_FEATURES = 64
BATCH = 32            # small demo batch; kernel tiles packed rows in blocks of up to 4096
SIGMA_INIT = 0.017
LN_EPS = 1e-5


def linear_module_kernel(x_ref, w_ref, v_ref, o_ref):
    """Fused packed forward.

    x_ref : (TB, 2*I)  two samples per row (sample 2r in lanes [0,I), 2r+1 in [I,2I))
    w_ref : (2*I, 2*O) block-diagonal [[eff_w, 0], [0, eff_w]] with eff_w pre-folded (I,O)
    v_ref : (3, 2*O)   rows = eff_bias, gamma, beta, each tiled twice along lanes
    o_ref : (TB, 2*O)  lane-dense output; each 64-lane half is one sample's features
    """
    # F.linear with the pre-folded noisy weight: f32 accumulation on the MXU,
    # contraction directly on the shared (2*I) axis -- no transpose.
    y = jnp.dot(x_ref[...], w_ref[...], preferred_element_type=jnp.float32)
    v = v_ref[...].astype(jnp.float32)
    y = y + v[0:1]                                    # eff_bias (packed twice along lanes)

    # LayerNorm per 64-lane half (one sample each), elementwise affine.  Masked
    # lane reductions keep the tile lane-dense -- no reshape, no sub-128 stores.
    two_o = y.shape[-1]
    o = two_o // 2
    lane = jax.lax.broadcasted_iota(jnp.int32, y.shape, 1)
    is_hi = lane >= o
    inv_o = 1.0 / o
    sum_lo = jnp.sum(jnp.where(is_hi, 0.0, y), axis=-1, keepdims=True)
    sum_hi = jnp.sum(jnp.where(is_hi, y, 0.0), axis=-1, keepdims=True)
    mean = jnp.where(is_hi, sum_hi, sum_lo) * inv_o
    d = y - mean
    d2 = d * d
    ss_lo = jnp.sum(jnp.where(is_hi, 0.0, d2), axis=-1, keepdims=True)
    ss_hi = jnp.sum(jnp.where(is_hi, d2, 0.0), axis=-1, keepdims=True)
    var = jnp.where(is_hi, ss_hi, ss_lo) * inv_o
    y = d * jax.lax.rsqrt(var + LN_EPS)
    y = y * v[1:2] + v[2:3]                           # gamma, beta (packed)

    # Activation: relu.  Dropout(p=0.0) == Identity.
    y = jnp.maximum(y, 0.0)
    o_ref[...] = y.astype(o_ref.dtype)


def prepare_params(weight, sigma_weight, epsilon_weight,
                   bias, sigma_bias, epsilon_bias, gamma, beta, dtype=None):
    """One-time parameter re-layout (re-run whenever epsilon noise is resampled).

    Folds the NoisyLinear combine and builds:
      * w_bd:   (2*I, 2*O) block-diagonal effective weight (feature-major), and
      * v_stack: (3, 2*O)  [eff_bias, gamma, beta], each tiled twice along lanes,
    so the kernel sees 3 DMA streams and does zero per-step parameter math.
    """
    out_f, in_f = weight.shape
    eff_w = (weight + sigma_weight * epsilon_weight).T          # (I, O)
    eff_b = bias + sigma_bias * epsilon_bias                    # (O,)
    if dtype is not None:
        eff_w = eff_w.astype(dtype)
    w_bd = jnp.zeros((2 * in_f, 2 * out_f), eff_w.dtype)
    w_bd = w_bd.at[:in_f, :out_f].set(eff_w)
    w_bd = w_bd.at[in_f:, out_f:].set(eff_w)
    v_stack = jnp.stack([jnp.tile(eff_b, 2), jnp.tile(gamma, 2), jnp.tile(beta, 2)],
                        axis=0)                                  # (3, 2*O)
    return w_bd, v_stack


def _pick_block_rows(bp, cap=4096):
    """Packed-row tile size.

    cap = 4096 packed rows = 8192 samples (~6 MiB double-buffered x+out in f32,
    fits every generation's default scoped VMEM).  Once the batch is big enough
    to amortize the ~0.35 us/step overhead, split into >= 2 grid steps so the
    'parallel' axis shards across v7x's 2 TensorCores.
    """
    if bp <= cap:
        if bp >= 2048 and bp % 16 == 0:
            return bp // 2
        return bp
    steps = -(-bp // cap)             # ceil
    block = -(-bp // steps)           # balanced tiles
    return ((block + 7) // 8) * 8     # sublane multiple (row padding handles the rest)


def linear_module_forward(x, w_bd, v_stack, *, block_rows=None, out_dtype=None):
    B, in_f = x.shape
    two_i, two_o = w_bd.shape
    assert two_i == 2 * in_f
    out_f = two_o // 2
    out_dtype = out_dtype or x.dtype

    # Pack two samples per row (free row-major reshape in the wrapper) so every
    # output store/DMA row is a full 128 lanes.
    pad_b = (-B) % 2
    if pad_b:
        x = jnp.concatenate([x, jnp.zeros((pad_b, in_f), x.dtype)], axis=0)
    bp = (B + pad_b) // 2
    xp = x.reshape(bp, two_i)

    if block_rows is None:
        block_rows = _pick_block_rows(bp)
    pad_r = (-bp) % block_rows
    if pad_r:
        xp = jnp.concatenate([xp, jnp.zeros((pad_r, two_i), xp.dtype)], axis=0)
    bp_pad = bp + pad_r
    grid = (bp_pad // block_rows,)

    out_p = pl.pallas_call(
        linear_module_kernel,
        out_shape=jax.ShapeDtypeStruct((bp_pad, two_o), out_dtype),
        grid=grid,
        in_specs=[
            pl.BlockSpec((block_rows, two_i), lambda i: (i, 0)),   # x, tiled over batch
            pl.BlockSpec((two_i, two_o), lambda i: (0, 0)),        # block-diag weight, resident
            pl.BlockSpec((3, two_o), lambda i: (0, 0)),            # bias/gamma/beta, resident
        ],
        out_specs=pl.BlockSpec((block_rows, two_o), lambda i: (i, 0)),
        compiler_params=pltpu.CompilerParams(
            # batch axis is embarrassingly parallel; with grid >= 2 it shards
            # across v7x's 2 TensorCores.
            dimension_semantics=("parallel",)),
    )(xp, w_bd, v_stack)

    # Unpack: row r lanes [0,O) -> sample 2r, lanes [O,2O) -> sample 2r+1.
    return out_p.reshape(bp_pad * 2, out_f)[:B]


def reference_forward(x, weight, sigma_weight, epsilon_weight,
                      bias, sigma_bias, epsilon_bias, gamma, beta):
    eff_w = weight + sigma_weight * epsilon_weight
    eff_b = bias + sigma_bias * epsilon_bias
    y = x @ eff_w.T + eff_b
    mean = jnp.mean(y, axis=-1, keepdims=True)
    var = jnp.mean((y - mean) ** 2, axis=-1, keepdims=True)
    y = (y - mean) / jnp.sqrt(var + LN_EPS)
    y = y * gamma + beta
    return jnp.maximum(y, 0.0)


if __name__ == "__main__":
    key = jax.random.PRNGKey(0)
    kx, kw, kb, kew, keb = jax.random.split(key, 5)

    bound = math.sqrt(3.0 / IN_FEATURES)
    x = jax.random.normal(kx, (BATCH, IN_FEATURES), dtype=jnp.float32)
    weight = jax.random.uniform(kw, (OUT_FEATURES, IN_FEATURES),
                                minval=-bound, maxval=bound, dtype=jnp.float32)
    bias = jax.random.uniform(kb, (OUT_FEATURES,),
                              minval=-bound, maxval=bound, dtype=jnp.float32)
    sigma_weight = jnp.full((OUT_FEATURES, IN_FEATURES), SIGMA_INIT, dtype=jnp.float32)
    sigma_bias = jnp.full((OUT_FEATURES,), SIGMA_INIT, dtype=jnp.float32)
    # sample_noise() equivalent (deterministic); zeros would model remove_noise().
    epsilon_weight = jax.random.normal(kew, (OUT_FEATURES, IN_FEATURES), dtype=jnp.float32)
    epsilon_bias = jax.random.normal(keb, (OUT_FEATURES,), dtype=jnp.float32)
    # LayerNorm affine params (torch default init: ones / zeros)
    gamma = jnp.ones((OUT_FEATURES,), dtype=jnp.float32)
    beta = jnp.zeros((OUT_FEATURES,), dtype=jnp.float32)

    # TODO(synk): dropout with p > 0 (training-mode RNG masking) not implemented; p=0.0 => Identity.
    # NOTE: if NoisyLinear noise is resampled per step, re-run prepare_params to re-fold eff_w/eff_b.
    w_bd, v_stack = prepare_params(weight, sigma_weight, epsilon_weight,
                                   bias, sigma_bias, epsilon_bias, gamma, beta)

    # Small demo batch; force block_rows=8 so the tiled multi-step ("parallel") path is exercised.
    out = linear_module_forward(x, w_bd, v_stack, block_rows=8)
    out = jax.block_until_ready(out)

    ref = reference_forward(x, weight, sigma_weight, epsilon_weight,
                            bias, sigma_bias, epsilon_bias, gamma, beta)
    assert out.shape == (BATCH, OUT_FEATURES)
    assert jnp.allclose(out, ref, atol=1e-5, rtol=1e-5)
    print("KERNEL_OK")
</pallas_src>

<mosaic_0001>
module attributes {stable_mosaic.version = 11 : i64} {
  func.func @linear_module_kernel(%arg0: i32, %arg1: memref<8x64xf32, #tpu.memory_space<vmem>>, %arg2: memref<64x128xf32, #tpu.memory_space<vmem>>, %arg3: memref<3x128xf32, #tpu.memory_space<vmem>>, %arg4: memref<8x128xf32, #tpu.memory_space<vmem>>) attributes {dimension_semantics = [#tpu.dimension_semantics<parallel>], iteration_bounds = array<i64: 2>, scalar_prefetch = 0 : i64, scratch_operands = 0 : i64, tpu.core_type = #tpu.core_type<tc>, window_params = [{transform_indices = @transform_0, window_bounds = array<i64: 8, 64>}, {pipeline_mode = #tpu.pipeline_mode<synchronous>, transform_indices = @transform_1, window_bounds = array<i64: 64, 128>}, {pipeline_mode = #tpu.pipeline_mode<synchronous>, transform_indices = @transform_2, window_bounds = array<i64: 3, 128>}, {transform_indices = @transform_3, window_bounds = array<i64: 8, 128>}]} {
    %c0 = arith.constant 0 : index
    %c0_0 = arith.constant 0 : index
    %0 = vector.load %arg1[%c0, %c0_0] : memref<8x64xf32, #tpu.memory_space<vmem>>, vector<8x64xf32>
    %c0_1 = arith.constant 0 : index
    %c0_2 = arith.constant 0 : index
    %1 = vector.load %arg2[%c0_1, %c0_2] : memref<64x128xf32, #tpu.memory_space<vmem>>, vector<64x128xf32>
    %cst = arith.constant dense<0.000000e+00> : vector<8x128xf32>
    %2 = tpu.matmul %0, %1, %cst {dimension_numbers = #tpu.dot_dimension_numbers<[1], [0], [0], [1], [0, 0, 1, 1], [], []>} : vector<8x64xf32>, vector<64x128xf32>, vector<8x128xf32> -> vector<8x128xf32>
    %c0_3 = arith.constant 0 : index
    %c0_4 = arith.constant 0 : index
    %3 = vector.load %arg3[%c0_3, %c0_4] : memref<3x128xf32, #tpu.memory_space<vmem>>, vector<3x128xf32>
    %4 = vector.extract_strided_slice %3 {offsets = [0, 0], sizes = [1, 128], strides = [1, 1]} : vector<3x128xf32> to vector<1x128xf32>
    %5 = vector.broadcast %4 : vector<1x128xf32> to vector<8x128xf32>
    %6 = arith.addf %2, %5 : vector<8x128xf32>
    %7 = tpu.iota {dimensions = array<i32: 1>} : vector<8x128xi32>
    %c64_i32 = arith.constant 64 : i32
    %8 = vector.broadcast %c64_i32 : i32 to vector<8x128xi32>
    %9 = arith.cmpi sge, %7, %8 : vector<8x128xi32>
    %cst_5 = arith.constant 0.000000e+00 : f32
    %10 = vector.broadcast %cst_5 : f32 to vector<8x128xf32>
    %11 = arith.select %9, %10, %6 : vector<8x128xi1>, vector<8x128xf32>
    %cst_6 = arith.constant dense<0.000000e+00> : vector<8xf32>
    %12 = vector.multi_reduction <add>, %11, %cst_6 [1] : vector<8x128xf32> to vector<8xf32>
    %13 = vector.shape_cast %12 : vector<8xf32> to vector<8x1xf32>
    %cst_7 = arith.constant 0.000000e+00 : f32
    %14 = vector.broadcast %cst_7 : f32 to vector<8x128xf32>
    %15 = arith.select %9, %6, %14 : vector<8x128xi1>, vector<8x128xf32>
    %cst_8 = arith.constant dense<0.000000e+00> : vector<8xf32>
    %16 = vector.multi_reduction <add>, %15, %cst_8 [1] : vector<8x128xf32> to vector<8xf32>
    %17 = vector.shape_cast %16 : vector<8xf32> to vector<8x1xf32>
    %18 = vector.shape_cast %17 : vector<8x1xf32> to vector<8x1xf32>
    %19 = vector.broadcast %18 : vector<8x1xf32> to vector<8x128xf32>
    %20 = vector.shape_cast %13 : vector<8x1xf32> to vector<8x1xf32>
    %21 = vector.broadcast %20 : vector<8x1xf32> to vector<8x128xf32>
    %22 = arith.select %9, %19, %21 : vector<8x128xi1>, vector<8x128xf32>
    %cst_9 = arith.constant 1.562500e-02 : f32
    %23 = vector.broadcast %cst_9 : f32 to vector<8x128xf32>
    %24 = arith.mulf %22, %23 : vector<8x128xf32>
    %25 = arith.subf %6, %24 : vector<8x128xf32>
    %26 = arith.mulf %25, %25 : vector<8x128xf32>
    %cst_10 = arith.constant 0.000000e+00 : f32
    %27 = vector.broadcast %cst_10 : f32 to vector<8x128xf32>
    %28 = arith.select %9, %27, %26 : vector<8x128xi1>, vector<8x128xf32>
    %cst_11 = arith.constant dense<0.000000e+00> : vector<8xf32>
    %29 = vector.multi_reduction <add>, %28, %cst_11 [1] : vector<8x128xf32> to vector<8xf32>
    %30 = vector.shape_cast %29 : vector<8xf32> to vector<8x1xf32>
    %cst_12 = arith.constant 0.000000e+00 : f32
    %31 = vector.broadcast %cst_12 : f32 to vector<8x128xf32>
    %32 = arith.select %9, %26, %31 : vector<8x128xi1>, vector<8x128xf32>
    %cst_13 = arith.constant dense<0.000000e+00> : vector<8xf32>
    %33 = vector.multi_reduction <add>, %32, %cst_13 [1] : vector<8x128xf32> to vector<8xf32>
    %34 = vector.shape_cast %33 : vector<8xf32> to vector<8x1xf32>
    %35 = vector.shape_cast %34 : vector<8x1xf32> to vector<8x1xf32>
    %36 = vector.broadcast %35 : vector<8x1xf32> to vector<8x128xf32>
    %37 = vector.shape_cast %30 : vector<8x1xf32> to vector<8x1xf32>
    %38 = vector.broadcast %37 : vector<8x1xf32> to vector<8x128xf32>
    %39 = arith.select %9, %36, %38 : vector<8x128xi1>, vector<8x128xf32>
    %cst_14 = arith.constant 1.562500e-02 : f32
    %40 = vector.broadcast %cst_14 : f32 to vector<8x128xf32>
    %41 = arith.mulf %39, %40 : vector<8x128xf32>
    %cst_15 = arith.constant 9.99999974E-6 : f32
    %42 = vector.broadcast %cst_15 : f32 to vector<8x128xf32>
    %43 = arith.addf %41, %42 : vector<8x128xf32>
    %44 = math.rsqrt %43 : vector<8x128xf32>
    %45 = arith.mulf %25, %44 : vector<8x128xf32>
    %46 = vector.extract_strided_slice %3 {offsets = [1, 0], sizes = [1, 128], strides = [1, 1]} : vector<3x128xf32> to vector<1x128xf32>
    %47 = vector.broadcast %46 : vector<1x128xf32> to vector<8x128xf32>
    %48 = arith.mulf %45, %47 : vector<8x128xf32>
    %49 = vector.extract_strided_slice %3 {offsets = [2, 0], sizes = [1, 128], strides = [1, 1]} : vector<3x128xf32> to vector<1x128xf32>
    %50 = vector.broadcast %49 : vector<1x128xf32> to vector<8x128xf32>
    %51 = arith.addf %48, %50 : vector<8x128xf32>
    %cst_16 = arith.constant 0.000000e+00 : f32
    %52 = vector.broadcast %cst_16 : f32 to vector<8x128xf32>
    %53 = arith.maximumf %51, %52 : vector<8x128xf32>
    %c0_17 = arith.constant 0 : index
    %c0_18 = arith.constant 0 : index
    %54 = vector.load %arg4[%c0_17, %c0_18] : memref<8x128xf32, #tpu.memory_space<vmem>>, vector<8x128xf32>
    tpu.vector_store %arg4[%c0_17, %c0_18], %53 {strides = array<i32>} : memref<8x128xf32, #tpu.memory_space<vmem>>, vector<8x128xf32>,
    return
  }
  func.func @transform_0(%arg0: i32) -> (i32, i32) {
    %c0_i32 = arith.constant 0 : i32
    %c0_i32_0 = arith.constant 0 : i32
    return %arg0, %c0_i32 : i32, i32
  }
  func.func @transform_1(%arg0: i32) -> (i32, i32) {
    %c0_i32 = arith.constant 0 : i32
    %c0_i32_0 = arith.constant 0 : i32
    %c0_i32_1 = arith.constant 0 : i32
    return %c0_i32, %c0_i32_0 : i32, i32
  }
  func.func @transform_2(%arg0: i32) -> (i32, i32) {
    %c0_i32 = arith.constant 0 : i32
    %c0_i32_0 = arith.constant 0 : i32
    %c0_i32_1 = arith.constant 0 : i32
    return %c0_i32, %c0_i32_0 : i32, i32
  }
  func.func @transform_3(%arg0: i32) -> (i32, i32) {
    %c0_i32 = arith.constant 0 : i32
    %c0_i32_0 = arith.constant 0 : i32
    return %arg0, %c0_i32 : i32, i32
  }
}

</mosaic_0001>

<bundles_post_ra>
// kernel: tpu_custom_call.1
= control target key start
LH: loop header
LB: loop body
LE: loop exit
PB: predicated region body
PF: predicated region fallthrough
CT: control target
= control target key end

     0   :  { %8 = vsyncpa [#allocation3], 0  ;;  %s911_s0 = inlined_call_operand.hbm [shape: f32[16,64], index: 0, kind: input, shape index: {}]   ;;  %s912_s1 = inlined_call_operand.hbm [shape: f32[64,128], index: 1, kind: input, shape index: {}]   ;;  %s913_s2 = inlined_call_operand.hbm [shape: f32[3,128], index: 2, kind: input, shape index: {}]   ;;  %s914_s3 = inlined_call_operand.hbm [shape: f32[16,128], index: 3, kind: output, shape index: {}]  }
   0x1   :  { %10 = vsyncpa [#allocation3 + $0x1], 0 }
   0x2   :  { %11 = vsyncpa [#allocation6], 0 }
   0x3   :  { %12 = vsyncpa [#allocation4], 0 }
   0x4   :  { %14 = vsyncpa [#allocation4 + $0x1], 0  ;;  %s736_s12 = smov 0   ;;  %s738_s13 = smov 0  }
   0x5   :  { %s740_s14 = smov 0   ;;  %s742_s15 = smov 0  }
   0x6 LB: > { %s757_s16 = sadd.s32 4294967295, %s706_s15   ;;  %s440_s17 = sadd.s32 4294967294, %s706_s15   ;;  %s706_s15 = sphi %s742_s15, %s936_s15   ;;  %s702_s14 = sphi %s740_s14, %s935_s14   ;;  %s698_s13 = sphi %s738_s13, %s934_s13   ;;  %s694_s12 = sphi %s736_s12, %s933_s12  }
   0x7   : > { %p40_p0 = scmp.ne.s32.totalorder %s698_s13, %s694_s12  ;;  %p915_p1 = scmp.eq.s32.totalorder %s757_s16, 0 }
   0x8   : > { %p112_p3 = scmp.eq.s32.totalorder %s440_s17, 1  ;;  %p441_p5 = scmp.ge.s32.totalorder %s706_s15, 1 }
   0x9   : > { %p766_p4 = por %p915_p1, %p40_p0  ;;  %p119_p7 = scmp.lt.s32.totalorder %s706_s15, 3 }
   0xa   : > { %p771_p6 = por %p112_p3, %p40_p0  ;;  %s708_s21 = smov [#allocation5]  }
   0xb   : > { %s919_s18 = scalar_select %p766_p4, 1, 0 }
   0xc   : > { %s920_s19 = scalar_select %p771_p6, 1, 0 }
   0xd   : > { %p776_p8 = pnand %p441_p5, %p119_p7  ;;  %s131_s22 = sshll.u32 %s708_s21, 4  ;;  %s132_s22 = int_to_ptr.vmem [resolvable:$true] %s131_s22 }
   0xe   : > { %s709_s24 = smov [#allocation7]   ;;  %s569_s26 = scalar_lea.vmem %s132_s22, 1024 }
   0xf   : > { %s921_s20 = scalar_select %p776_p8, 1, 0 }
  0x10   : > { %p497_p9 = pneg %p776_p8  ;;  %s145_s25 = sshll.u32 %s709_s24, 4  ;;  %s146_s25 = int_to_ptr.vmem [resolvable:$true] %s145_s25 }
  0x11   : > { %p570_p13 = scmp.ne.s32.totalorder %s132_s22, %s569_s26  ;;  %p577_p5 = scmp.lt.s32.totalorder %s132_s22, %s132_s22 }
  0x12   : > { %p785_p11 = pnand %p497_p9, %p915_p1  ;;  %p578_p7 = scmp.lt.s32.totalorder %s569_s26, %s569_s26 }
  0x14   : > { %p560_p12 = pneg %p785_p11  ;;  %p579_p10 = por %p578_p7, %p577_p5 }
  0x16   : > { %p572_p0 = pnand %p570_p13, %p560_p12 }
  0x18   : > { %p573_p3 = pneg %p572_p0 }
  0x1a   : > { %p580_p9 = pnand %p579_p10, %p573_p3 }
  0x1c   : > { %583 = shalt.err (!%p580_p9)
}
  0x1d   : > { %s710_s27 = smov 128   ;;  %s711_s28 = smov 8  }
  0x1e   : > { %500 = dma.hbm_to_vmem [thread:$0]  (!%p785_p11), %s912_s1, 1024, %s132_s22, [#allocation6], %s710_s27, %s710_s27, %s711_s28  }
  0x1f   : > { %s595_s4 = scalar_lea.vmem %s146_s25, 64  ;;  %p603_p2 = scmp.lt.s32.totalorder %s146_s25, %s146_s25 }
  0x20   : > { %p596_p1 = scmp.ne.s32.totalorder %s146_s25, %s595_s4  ;;  %p604_p6 = scmp.lt.s32.totalorder %s595_s4, %s595_s4 }
  0x22   : > { %p598_p13 = pnand %p596_p1, %p560_p12  ;;  %p605_p5 = por %p604_p6, %p603_p2 }
  0x24   : > { %p599_p0 = pneg %p598_p13 }
  0x26   : > { %p606_p10 = pnand %p605_p5, %p599_p0 }
  0x28   : > { %609 = shalt.err (!%p606_p10)
}
  0x29   : > { %503 = dma.hbm_to_vmem [thread:$0]  (!%p785_p11), %s913_s2, 64, %s146_s25, [#allocation6]  }
  0x2a   : > { %s808_s7 = sadd.s32 1, %s706_s15   ;;  %s27_s8 = sadd.s32 1, %s702_s14 }
  0x2b   : > { %s24_s9 = ssub.s32 %s706_s15, %s808_s7  ;;  %p34_p1 = scmp.ne.s32.totalorder %s702_s14, %s698_s13 }
  0x2c   : > { %p25_p2 = scmp.eq.s32.totalorder %s24_s9, 0  ;;  %p35_p6 = scmp.eq.s32.totalorder %s706_s15, 0 }
  0x2d   : > { %p923_p12 = scmp.eq.s32.totalorder %s757_s16, 1  ;;  %p514_p7 = scmp.lt.s32.totalorder %s706_s15, 2 }
  0x2e   : > { %s824_s11 = scalar_select %p25_p2, %s702_s14, %s27_s8  }
  0x2f   : > { %p818_p3 = por %p923_p12, %p34_p1  ;;  %p36_p9 = por %p35_p6, %p34_p1 }
  0x30   : > { %s156_s17 = sand.u32 1, %s702_s14   ;;  %s446_s22 = sshll.u32 %s706_s15, 7 }
  0x31   : > { %s924_s10 = scalar_select %p818_p3, 1, 0 }
  0x32   : > { %s445_s21 = sshll.u32 %s156_s17, 3  ;;  %s831_s25 = scalar_lea.hbm %s911_s0, %s446_s22 }
  0x33   : > { %s160_s26 = scalar_lea.vmem [#allocation2], %s445_s21  ;;  %p833_p11 = pnand %p514_p7, %p36_p9 }
  0x34   : > { %s167_s27 = sshll.u32 %s160_s26, 4  ;;  %s157_s29 = scalar_lea.sflag [#allocation3], %s156_s17  ;;  %s168_s27 = int_to_ptr.vmem [resolvable:$true] %s167_s27 }
  0x35   : > { %s610_s30 = scalar_lea.hbm %s831_s25, 128  ;;  %p612_p0 = pneg %p833_p11 }
  0x36   : > { %p611_p13 = scmp.ne.s32.totalorder %s831_s25, %s610_s30  ;;  %s615_s6 = scalar_lea.hbm %s911_s0, 256 }
  0x37   : > { %p616_p1 = scmp.lt.s32.totalorder %s831_s25, %s911_s0  ;;  %p617_p2 = scmp.lt.s32.totalorder %s615_s6, %s610_s30 }
  0x38   : > { %p613_p5 = pnand %p612_p0, %p611_p13 }
  0x39   : > { %p618_p6 = por %p617_p2, %p616_p1 }
  0x3a   : > { %p614_p10 = pneg %p613_p5 }
  0x3c   : > { %p619_p12 = pnand %p618_p6, %p614_p10 }
  0x3e   : > { %622 = shalt.err (!%p619_p12)
}
  0x3f   : > { %s623_s21 = scalar_lea.vmem %s168_s27, 128  ;;  %s712_s17 = smov [#allocation2]  }
  0x40   : > { %p624_p7 = scmp.ne.s32.totalorder %s168_s27, %s623_s21  ;;  %s628_s22 = sshll.u32 %s712_s17, 4  ;;  %s629_s22 = int_to_ptr.vmem [resolvable:$false] %s628_s22 }
  0x41   : > { %s630_s23 = scalar_lea.vmem %s629_s22, 256  ;;  %p631_p13 = scmp.lt.s32.totalorder %s168_s27, %s629_s22 }
  0x42   : > { %p626_p9 = pnand %p624_p7, %p612_p0  ;;  %p632_p5 = scmp.lt.s32.totalorder %s630_s23, %s623_s21 }
  0x44   : > { %p627_p3 = pneg %p626_p9  ;;  %p633_p4 = por %p632_p5, %p631_p13 }
  0x46   : > { %p634_p8 = pnand %p633_p4, %p627_p3 }
  0x48   : > { %637 = shalt.err (!%p634_p8)
}
  0x49   : > { %507 = dma.hbm_to_vmem [thread:$0]  (!%p833_p11), %s831_s25, 128, %s168_s27, %s157_s29  }
  0x4a   : > { %p926_p10 = scmp.ne.s32.totalorder %s921_s20, 0 }
  0x4b   : > { %s854_s24 = sand.u32 (!%p926_p10), 1, %s698_s13   ;;  %p927_p4 = scmp.ne.s32.totalorder (!%p926_p10), %s919_s18, 0 }
  0x4c   : > { %176 = sbr.rel (%p926_p10) target bundleno = 630 (0x276), region = 32  ;;  %s448_s26 = sshll.u32 (!%p926_p10), %s854_s24, 3 }
  0x4d   : > { %s179_s30 = scalar_lea.sflag (!%p926_p10), [#allocation3], %s854_s24  ;;  %s182_s4 = scalar_lea.vmem (!%p926_p10), [#allocation2], %s448_s26 }
  0x51   : > { %681 = dma.done.wait (%p927_p4), %s179_s30, 128  }
  0x52   : > { %683 = vsyncadd (%p927_p4), %s179_s30, 4294967168  ;;  %p928_p8 = scmp.eq.s32.totalorder %s757_s16, 0 }
  0x54   : > { %685 = dma.done.wait (%p928_p8), [#allocation6], 1088   ;;  %p929_p3 = pmov %p928_p8 }
  0x55   : > { %v713_v0 = vmov 0.0   ;;  %vm714_vm0 = vmmov 0   ;;  %v221_v1 = vld [vmem:[#allocation5 + $0x38] sm:$0xff]  ;;  %v220_v2 = vld [vmem:[#allocation5 + $0x30] sm:$0xff]  ;;  %v219_v3 = vld [vmem:[#allocation5 + $0x28] sm:$0xff]  ;;  %vm227_vm1 = vcmask 523264   ;;  %v223_v10 = vlaneseq }
  0x56   : > { %687 = vsyncadd (%p929_p3), [#allocation6], 4294966208  ;;  %466 = vmatprep.subr.mxu0 %v713_v0  ;;  %482 = vmatprep.mubr.msk.f32.mxu0 %vm714_vm0, %v713_v0  ;;  %v218_v4 = vld [vmem:[#allocation5 + $0x20] sm:$0xff]  ;;  %v217_v5 = vld [vmem:[#allocation5 + $0x18] sm:$0xff]  ;;  %s454_s18 = sshll.u32 %s757_s16, 7  ;;  %s212_s20 = scalar_lea.vmem [#allocation8], %s448_s26 }
  0x57   : > { %467 = vmatpush3.msra.mxu0 %v221_v1  ;;  %v216_v6 = vld [vmem:[#allocation5 + $0x10] sm:$0xff]  ;;  %v215_v7 = vld [vmem:[#allocation5 + $0x8] sm:$0xff]  ;;  %v214_v8 = vld [vmem:[#allocation5] sm:$0xff]  ;;  %v224_v11 = vshrl.u32 %v223_v10, 7  ;;  %v302_v14 = vand.u32 127, %v223_v10  ;;  %s351_s25 = sshll.u32 %s212_s20, 4  ;;  %s349_s29 = scalar_lea.hbm %s914_s3, %s454_s18  ;;  %s352_s25 = int_to_ptr.vmem [resolvable:$true] %s351_s25 }
  0x58   : > { %468 = vmatprep.subr.mxu0 %v713_v0  ;;  %v213_v9 = vld [vmem:[%s182_s4] sm:$0xff]  ;;  %v222_v13 = vld [vmem:[#allocation7] sm:$0x7]  ;;  %s338_s5 = scalar_lea.sflag [#allocation4], %s854_s24  ;;  %s638_s6 = scalar_lea.vmem %s352_s25, 128 }
  0x59   : > { %469 = vmatpush3.msra.mxu0 %v220_v2  ;;  %v225_v12 = vsub.s32 0, %v224_v11  ;;  %vm303_vm2 = vcmp.ge.s32.totalorder %v302_v14, 64  ;;  %v327_v34 = vsub.s32 1, %v224_v11  ;;  %v332_v35 = vsub.s32 2, %v224_v11  ;;  %p639_p11 = scmp.ne.s32.totalorder %s352_s25, %s638_s6  ;;  %p930_p0 = scmp.ne.s32.totalorder %s924_s10, 0 }
  0x5a   : > { %470 = vmatprep.subr.mxu0 %v713_v0  ;;  %s715_s8 = smov [#allocation8]  }
  0x5b   : > { %471 = vmatpush3.msra.mxu0 %v219_v3  ;;  %v226_v15 = vrot.slane %v222_v13, %v225_v12  ;;  %v328_v36 = vrot.slane %v222_v13, %v327_v34  ;;  %v333_v38 = vrot.slane %v222_v13, %v332_v35  ;;  %p640_p1 = pnand %p639_p11, %p930_p0  ;;  %s642_s9 = sshll.u32 %s715_s8, 4  ;;  %s643_s9 = int_to_ptr.vmem [resolvable:$false] %s642_s9 }
  0x5c   : > { %472 = vmatprep.subr.mxu0 %v713_v0  ;;  %s644_s16 = scalar_lea.vmem %s643_s9, 256  ;;  %p645_p6 = scmp.lt.s32.totalorder %s352_s25, %s643_s9 }
  0x5d   : > { %473 = vmatpush3.msra.mxu0 %v218_v4  ;;  %p641_p2 = pneg %p640_p1  ;;  %p646_p12 = scmp.lt.s32.totalorder %s644_s16, %s638_s6 }
  0x5e   : > { %474 = vmatprep.subr.mxu0 %v713_v0 }
  0x5f   : > { %475 = vmatpush3.msra.mxu0 %v217_v5  ;;  %p647_p7 = por %p646_p12, %p645_p6 }
  0x60   : > { %476 = vmatprep.subr.mxu0 %v713_v0 }
  0x61   : > { %477 = vmatpush3.msra.mxu0 %v216_v6  ;;  %p648_p9 = pnand %p647_p7, %p641_p2 }
  0x62   : > { %478 = vmatprep.subr.mxu0 %v713_v0 }
  0x63   : > { %479 = vmatpush3.msra.mxu0 %v215_v7 }
  0x64   : > { %480 = vmatprep.subr.mxu0 %v713_v0 }
  0x65   : > { %481 = vmatpush3.msra.mxu0 %v214_v8 }
  0x66   : > { %483 = vmatmul.mubr.msk.f32.vlgmr.msra.gmra.mxu0 %vm227_vm1, %v213_v9 }
 0x126   : > { %v297_v16 = vpop.f32.mrf.mxu0 }
 0x127   : > { %v298_v17 = vadd.f32 %v297_v16, %v226_v15 }
 0x128   : > { %v484_v18 = vpop.f32.mrf.mxu0 }
 0x129   : > { %v304_v19 = vsel %vm303_vm2, 0.0, %v298_v17  ;;  %v307_v20 = vsel %vm303_vm2, %v298_v17, 0.0 }
 0x12a   : > { %305 = vadd.xlane.f32.xlu0 %v304_v19 }
 0x12e   : > { %308 = vadd.xlane.f32.xlu0 %v307_v20 }
 0x1b3   : > { %v306_v21 = vpop.xlane.xlu0 %305 }
 0x1b7   : > { %v309_v22 = vpop.xlane.xlu0 %308 }
 0x1b8   : > { %v310_v23 = vsel %vm303_vm2, %v309_v22, %v306_v21 }
 0x1b9   : > { %v311_v24 = vmul.f32 0.015625, %v310_v23 }
 0x1bb   : > { %v312_v25 = vsub.f32 %v298_v17, %v311_v24 }
 0x1bd   : > { %v313_v26 = vmul.f32 %v312_v25, %v312_v25 }
 0x1bf   : > { %v314_v27 = vsel %vm303_vm2, 0.0, %v313_v26  ;;  %v317_v28 = vsel %vm303_vm2, %v313_v26, 0.0 }
 0x1c0   : > { %315 = vadd.xlane.f32.xlu1 %v314_v27 }
 0x1c4   : > { %318 = vadd.xlane.f32.xlu1 %v317_v28 }
 0x249   : > { %v316_v29 = vpop.xlane.xlu1 %315 }
 0x24d   : > { %v319_v30 = vpop.xlane.xlu1 %318 }
 0x24e   : > { %v320_v31 = vsel %vm303_vm2, %v319_v30, %v316_v29 }
 0x24f   : > { %v321_v32 = vmul.f32 0.015625, %v320_v31 }
 0x251   : > { %v322_v33 = vadd.f32 1e-05, %v321_v32 }
 0x253   : > { %556 = vrsqrt.f32 %v322_v33 }
 0x260   : > { %v557_v37 = vpop.eup %556 }
 0x261   : > { %v324_v39 = vmul.f32 %v557_v37, %v312_v25 }
 0x263   : > { %v329_v40 = vmul.f32 %v328_v36, %v324_v39 }
 0x265   : > { %v334_v41 = vadd.f32 %v333_v38, %v329_v40 }
 0x267   : > { %v335_v42 = vmax.f32 %v334_v41, 0.0 }
 0x269   : > { %336 = vst [vmem:[%s212_s20] sm:$0xff] %v335_v42 }
 0x26a   : > { %651 = shalt.err (!%p648_p9)
}
 0x26b   : > { %s652_s21 = scalar_lea.hbm %s349_s29, 128  ;;  %s656_s23 = scalar_lea.hbm %s914_s3, 256 }
 0x26c   : > { %p653_p13 = scmp.ne.s32.totalorder %s349_s29, %s652_s21  ;;  %p657_p4 = scmp.lt.s32.totalorder %s349_s29, %s914_s3 }
 0x26d   : > { %p658_p8 = scmp.lt.s32.totalorder %s656_s23, %s652_s21 }
 0x26e   : > { %p654_p5 = pnand %p653_p13, %p930_p0 }
 0x26f   : > { %p659_p3 = por %p658_p8, %p657_p4 }
 0x270   : > { %p655_p10 = pneg %p654_p5 }
 0x272   : > { %p660_p11 = pnand %p659_p3, %p655_p10 }
 0x274   : > { %663 = shalt.err (!%p660_p11)
}
 0x275   : > { %495 = dma.vmem_to_hbm [thread:$0]  (%p930_p0), %s352_s25, 128, %s349_s29, %s338_s5  }
 0x276 PF: > { %s363_s30 = sand.u32 1, %s694_s12   ;;  %p931_p1 = scmp.ne.s32.totalorder %s920_s19, 0 }
 0x277   : > { %p932_p2 = scmp.ge.s32.totalorder %s706_s15, 2  ;;  %s364_s4 = scalar_lea.sflag [#allocation4], %s363_s30 }
 0x279   : > { %p509_p6 = pnand %p932_p2, %p931_p1 }
 0x27b   : > { %p510_p12 = pneg %p509_p6 }
 0x27d   : > { %689 = dma.done.wait (%p510_p12), %s364_s4, 128  }
 0x27e   : > { %691 = vsyncadd (%p510_p12), %s364_s4, 4294967168  ;;  %p17_p7 = scmp.ge.s32.totalorder %s808_s7, 4   ;;  %s933_s12 = smov %s698_s13 }
 0x27f   : > { %s934_s13 = smov %s702_s14  ;;  %s935_s14 = smov %s824_s11 }
 0x280   : > { %s936_s15 = smov %s808_s7  ;;  %19 = sbr.rel (!%p17_p7) target bundleno = 6 (0x6), region = 85 }
 0x285   :  { %369 = vsyncpa [#allocation3], 1 }
 0x286   :  { %371 = vsyncpa [#allocation3 + $0x1], 1 }
 0x287   :  { %372 = vsyncpa [#allocation6], 1 }
 0x288   :  { %373 = vsyncpa [#allocation4], 1 }
 0x289   :  { %375 = vsyncpa [#allocation4 + $0x1], 1 }

</bundles_post_ra>
